<compile_context>
chip_gen: v7x
topology: tpu7x:2x2x1
jax: 0.10.0
libtpu: 0.0.40
codegen_flags: <defaults>
</compile_context>

<pallas_src>
import functools
import math

import jax
import jax.numpy as jnp
from jax import lax
from jax.experimental import pallas as pl
from jax.experimental.pallas import tpu as pltpu


def _pick_tile(dim, candidates):
    """Largest candidate that divides `dim`; fall back to the full dimension."""
    for c in candidates:
        if c <= dim and dim % c == 0:
            return c
    return dim


def projection_kernel(x_ref, w_ref, b_ref, o_ref, acc_ref):
    # x_ref: (tm, tk)   w_ref: (tn, tk)   b_ref: (1, tn)
    # o_ref: (tm, tn)   acc_ref: (tm, tn) f32 scratch, resident across the K axis.
    k = pl.program_id(2)

    @pl.when(k == 0)
    def _():
        acc_ref[...] = jnp.zeros_like(acc_ref)

    # Contract the K axis of x (tm, tk) with the K axis of W (tn, tk):
    # equivalent to x @ W.T but keeps W in its natural layout (no transpose).
    acc_ref[...] += lax.dot_general(
        x_ref[...], w_ref[...],
        dimension_numbers=(((1,), (1,)), ((), ())),
        preferred_element_type=jnp.float32)

    @pl.when(k == pl.num_programs(2) - 1)
    def _():
        o_ref[...] = (acc_ref[...] + b_ref[...]).astype(o_ref.dtype)


def projection_layer(x, weight, bias, *, tm=None, tn=None, tk=None):
    """x: (B, S, D) ; weight: (V, D) ; bias: (V,)  ->  (B, S, V)."""
    B, S, D = x.shape
    V, D2 = weight.shape
    assert D == D2, "weight in-dim must match x last dim"
    assert bias.shape == (V,)

    M = B * S
    x2 = x.reshape(M, D)
    b2 = bias.reshape(1, V)

    # Tile choices: big lane-dense tiles to amortize the ~0.35 us/step overhead,
    # MXU-friendly sizes (multiples of 128/256), falling back to the full dim
    # when the problem is small (full-dim blocks satisfy the (8,128) rule).
    tm = tm or _pick_tile(M, (512, 256, 128, 64, 32, 16, 8))
    tn = tn or _pick_tile(V, (512, 256, 128))
    tk = tk or _pick_tile(D, (512, 256, 128))

    grid = (M // tm, V // tn, D // tk)

    out_dtype = x.dtype
    itemsize = jnp.dtype(out_dtype).itemsize
    # Explicit VMEM budget: double-buffered x / W / bias blocks + double-buffered
    # output block + the f32 accumulator scratch, with 2x headroom, clamped so we
    # never request more than v7x's 64 MiB physical VMEM.
    vmem_bytes = (2 * tm * tk * x.dtype.itemsize
                  + 2 * tn * tk * weight.dtype.itemsize
                  + 2 * tn * bias.dtype.itemsize
                  + 2 * tm * tn * itemsize
                  + tm * tn * 4)
    vmem_limit = int(min(max(2 * vmem_bytes, 16 * 1024 * 1024), 64 * 1024 * 1024))

    cost = pl.CostEstimate(
        flops=2 * M * V * D,
        transcendentals=0,
        bytes_accessed=(M * D * x.dtype.itemsize
                        + V * D * weight.dtype.itemsize
                        + V * bias.dtype.itemsize
                        + M * V * itemsize),
    )

    out_flat = pl.pallas_call(
        projection_kernel,
        out_shape=jax.ShapeDtypeStruct((M, V), out_dtype),
        grid_spec=pltpu.PrefetchScalarGridSpec(
            num_scalar_prefetch=0,
            grid=grid,
            in_specs=[
                pl.BlockSpec((tm, tk), lambda i, j, k: (i, k)),  # x block
                pl.BlockSpec((tn, tk), lambda i, j, k: (j, k)),  # W block (V, D) layout
                pl.BlockSpec((1, tn), lambda i, j, k: (0, j)),   # bias block
            ],
            out_specs=pl.BlockSpec((tm, tn), lambda i, j, k: (i, j)),
            scratch_shapes=[pltpu.VMEM((tm, tn), jnp.float32)],
        ),
        compiler_params=pltpu.CompilerParams(
            dimension_semantics=("parallel", "parallel", "arbitrary"),
            vmem_limit_bytes=vmem_limit,
        ),
        cost_estimate=cost,
    )(x2, weight, b2)

    return out_flat.reshape(B, S, V)


if __name__ == "__main__":
    # Small shapes consistent with the module (decoder hidden -> vocab logits).
    embed_dim = 128
    vocab_size = 256
    batch, seq = 2, 8

    key = jax.random.PRNGKey(0)
    kx, kw, kb = jax.random.split(key, 3)

    # nn.Linear default init: U(-1/sqrt(in_features), 1/sqrt(in_features)).
    bound = 1.0 / math.sqrt(embed_dim)
    weight = jax.random.uniform(kw, (vocab_size, embed_dim), jnp.float32, -bound, bound)
    bias = jax.random.uniform(kb, (vocab_size,), jnp.float32, -bound, bound)
    x = jax.random.normal(kx, (batch, seq, embed_dim), dtype=jnp.float32)

    out = projection_layer(x, weight, bias)
    out = jax.block_until_ready(out)

    # Reference: plain JAX linear layer.
    ref = jnp.einsum("bsd,vd->bsv", x, weight) + bias
    assert out.shape == (batch, seq, vocab_size)
    assert jnp.allclose(out, ref, atol=1e-4, rtol=1e-4)

    print("KERNEL_OK")
</pallas_src>

<mosaic_0001>
module attributes {stable_mosaic.version = 11 : i64} {
  func.func @projection_kernel(%arg0: i32, %arg1: i32, %arg2: i32, %arg3: memref<16x128xf32, #tpu.memory_space<vmem>>, %arg4: memref<256x128xf32, #tpu.memory_space<vmem>>, %arg5: memref<1x256xf32, #tpu.memory_space<vmem>>, %arg6: memref<16x256xf32, #tpu.memory_space<vmem>>, %arg7: memref<16x256xf32, #tpu.memory_space<vmem>>) attributes {dimension_semantics = [#tpu.dimension_semantics<parallel>, #tpu.dimension_semantics<parallel>, #tpu.dimension_semantics<arbitrary>], iteration_bounds = array<i64: 1, 1, 1>, scalar_prefetch = 0 : i64, scratch_operands = 1 : i64, tpu.core_type = #tpu.core_type<tc>, window_params = [{transform_indices = @transform_0, window_bounds = array<i64: 16, 128>}, {transform_indices = @transform_1, window_bounds = array<i64: 256, 128>}, {transform_indices = @transform_2, window_bounds = array<i64: 1, 256>}, {transform_indices = @transform_3, window_bounds = array<i64: 16, 256>}]} {
    %c0_i32 = arith.constant 0 : i32
    %0 = arith.cmpi eq, %arg2, %c0_i32 : i32
    %1 = arith.extui %0 : i1 to i32
    %c0_i32_0 = arith.constant 0 : i32
    %2 = arith.cmpi ne, %1, %c0_i32_0 : i32
    scf.if %2 {
      %cst_10 = arith.constant 0.000000e+00 : f32
      %12 = vector.broadcast %cst_10 : f32 to vector<16x256xf32>
      %c0_11 = arith.constant 0 : index
      %c0_12 = arith.constant 0 : index
      %13 = vector.load %arg7[%c0_11, %c0_12] : memref<16x256xf32, #tpu.memory_space<vmem>>, vector<16x256xf32>
      tpu.vector_store %arg7[%c0_11, %c0_12], %12 {strides = array<i32>} : memref<16x256xf32, #tpu.memory_space<vmem>>, vector<16x256xf32>,
    } else {
    }
    %c0 = arith.constant 0 : index
    %c0_1 = arith.constant 0 : index
    %3 = vector.load %arg7[%c0, %c0_1] : memref<16x256xf32, #tpu.memory_space<vmem>>, vector<16x256xf32>
    %c0_2 = arith.constant 0 : index
    %c0_3 = arith.constant 0 : index
    %4 = vector.load %arg3[%c0_2, %c0_3] : memref<16x128xf32, #tpu.memory_space<vmem>>, vector<16x128xf32>
    %c0_4 = arith.constant 0 : index
    %c0_5 = arith.constant 0 : index
    %5 = vector.load %arg4[%c0_4, %c0_5] : memref<256x128xf32, #tpu.memory_space<vmem>>, vector<256x128xf32>
    %cst = arith.constant dense<0.000000e+00> : vector<16x256xf32>
    %6 = tpu.matmul %4, %5, %cst {dimension_numbers = #tpu.dot_dimension_numbers<[1], [1], [0], [0], [0, 0, 1, 0], [], []>} : vector<16x128xf32>, vector<256x128xf32>, vector<16x256xf32> -> vector<16x256xf32>
    %7 = arith.addf %3, %6 : vector<16x256xf32>
    %c0_6 = arith.constant 0 : index
    %c0_7 = arith.constant 0 : index
    %8 = vector.load %arg7[%c0_6, %c0_7] : memref<16x256xf32, #tpu.memory_space<vmem>>, vector<16x256xf32>
    tpu.vector_store %arg7[%c0_6, %c0_7], %7 {strides = array<i32>} : memref<16x256xf32, #tpu.memory_space<vmem>>, vector<16x256xf32>,
    %c0_i32_8 = arith.constant 0 : i32
    %9 = arith.cmpi eq, %arg2, %c0_i32_8 : i32
    %10 = arith.extui %9 : i1 to i32
    %c0_i32_9 = arith.constant 0 : i32
    %11 = arith.cmpi ne, %10, %c0_i32_9 : i32
    scf.if %11 {
      %c0_10 = arith.constant 0 : index
      %c0_11 = arith.constant 0 : index
      %12 = vector.load %arg7[%c0_10, %c0_11] : memref<16x256xf32, #tpu.memory_space<vmem>>, vector<16x256xf32>
      %c0_12 = arith.constant 0 : index
      %c0_13 = arith.constant 0 : index
      %13 = vector.load %arg5[%c0_12, %c0_13] : memref<1x256xf32, #tpu.memory_space<vmem>>, vector<1x256xf32>
      %14 = vector.broadcast %13 : vector<1x256xf32> to vector<16x256xf32>
      %15 = arith.addf %12, %14 : vector<16x256xf32>
      %c0_14 = arith.constant 0 : index
      %c0_15 = arith.constant 0 : index
      %16 = vector.load %arg6[%c0_14, %c0_15] : memref<16x256xf32, #tpu.memory_space<vmem>>, vector<16x256xf32>
      tpu.vector_store %arg6[%c0_14, %c0_15], %15 {strides = array<i32>} : memref<16x256xf32, #tpu.memory_space<vmem>>, vector<16x256xf32>,
    } else {
    }
    return
  }
  func.func @transform_0(%arg0: i32, %arg1: i32, %arg2: i32) -> (i32, i32) {
    %c0_i32 = arith.constant 0 : i32
    return %arg0, %arg2 : i32, i32
  }
  func.func @transform_1(%arg0: i32, %arg1: i32, %arg2: i32) -> (i32, i32) {
    %c0_i32 = arith.constant 0 : i32
    return %arg1, %arg2 : i32, i32
  }
  func.func @transform_2(%arg0: i32, %arg1: i32, %arg2: i32) -> (i32, i32) {
    %c0_i32 = arith.constant 0 : i32
    %c0_i32_0 = arith.constant 0 : i32
    return %c0_i32, %arg1 : i32, i32
  }
  func.func @transform_3(%arg0: i32, %arg1: i32, %arg2: i32) -> (i32, i32) {
    %c0_i32 = arith.constant 0 : i32
    return %arg0, %arg1 : i32, i32
  }
}

</mosaic_0001>

<bundles_post_ra>
// kernel: tpu_custom_call.1
= control target key start
LH: loop header
LB: loop body
LE: loop exit
PB: predicated region body
PF: predicated region fallthrough
CT: control target
= control target key end

     0   :  { %8 = vsyncpa [#allocation4], 0  ;;  %s448_s0 = inlined_call_operand.hbm [shape: f32[16,128], index: 0, kind: input, shape index: {}]   ;;  %s449_s1 = inlined_call_operand.hbm [shape: f32[256,128], index: 1, kind: input, shape index: {}]   ;;  %s450_s2 = inlined_call_operand.vmem [shape: f32[1,256], index: 2, kind: input, shape index: {}]   ;;  %s451_s3 = inlined_call_operand.hbm [shape: f32[16,256], index: 3, kind: output, shape index: {}]  }
   0x1   :  { %9 = vsyncpa [#allocation7], 0 }
   0x2   :  { %10 = vsyncpa [#allocation5], 0  ;;  %s382_s12 = smov [#allocation3]   ;;  %s310_s16 = scalar_lea.hbm %s448_s0, 256 }
   0x3   :  { %s16_s13 = sshll.u32 %s382_s12, 4  ;;  %p311_p0 = scmp.ne.s32.totalorder %s448_s0, %s310_s16  ;;  %s17_s13 = int_to_ptr.vmem [resolvable:$true] %s16_s13 }
   0x4   :  { %p314_p1 = scmp.lt.u32.totalorder %s310_s16, %s448_s0 }
   0x6   :  { %p316_p2 = pnand %p314_p1, %p311_p0 }
   0x8   :  { %319 = shalt.err (!%p316_p2)
}
   0x9   :  { %s320_s21 = scalar_lea.vmem %s17_s13, 256  ;;  %p325_p4 = scmp.lt.s32.totalorder %s17_s13, %s17_s13 }
   0xa   :  { %p321_p3 = scmp.ne.s32.totalorder %s17_s13, %s320_s21  ;;  %p326_p5 = scmp.lt.s32.totalorder %s320_s21, %s320_s21 }
   0xc   :  { %p327_p6 = por %p326_p5, %p325_p4 }
   0xe   :  { %p328_p7 = pnand %p327_p6, %p321_p3 }
  0x10   :  { %331 = shalt.err (!%p328_p7)
}
  0x11   :  { %s383_s22 = smov 128   ;;  %s384_s23 = smov 8  }
  0x12   :  { %22 = dma.hbm_to_vmem [thread:$0]  %s448_s0, 256, %s17_s13, [#allocation4], %s383_s22, %s383_s22, %s384_s23  }
  0x13   :  { %s385_s26 = smov [#allocation6]   ;;  %s332_s30 = scalar_lea.hbm %s449_s1, 4096 }
  0x14   :  { %s28_s27 = sshll.u32 %s385_s26, 4  ;;  %p333_p8 = scmp.ne.s32.totalorder %s449_s1, %s332_s30  ;;  %s29_s27 = int_to_ptr.vmem [resolvable:$true] %s28_s27 }
  0x15   :  { %p336_p9 = scmp.lt.u32.totalorder %s332_s30, %s449_s1 }
  0x17   :  { %p338_p10 = pnand %p336_p9, %p333_p8 }
  0x19   :  { %341 = shalt.err (!%p338_p10)
}
  0x1a   :  { %s342_s8 = scalar_lea.vmem %s29_s27, 4096  ;;  %p347_p12 = scmp.lt.s32.totalorder %s29_s27, %s29_s27 }
  0x1b   :  { %p343_p11 = scmp.ne.s32.totalorder %s29_s27, %s342_s8  ;;  %p348_p13 = scmp.lt.s32.totalorder %s342_s8, %s342_s8 }
  0x1d   :  { %p349_p0 = por %p348_p13, %p347_p12 }
  0x1f   :  { %p350_p1 = pnand %p349_p0, %p343_p11 }
  0x21   :  { %353 = shalt.err (!%p350_p1)
}
  0x22   :  { %34 = dma.hbm_to_vmem [thread:$0]  %s449_s1, 4096, %s29_s27, [#allocation7], %s383_s22, %s383_s22, %s384_s23  }
  0x23   :  { %376 = dma.done.wait [#allocation4], 256  }
  0x24   :  { %377 = vsyncadd [#allocation4], 4294967040 }
  0x25   :  { %378 = dma.done.wait [#allocation7], 4096  }
  0x26   :  { %379 = vsyncadd [#allocation7], 4294963200  ;;  %v73_v0 = vld [vmem:[#allocation6 + $0x80] sm:$0xff]  ;;  %v74_v1 = vld [vmem:[#allocation6 + $0x88] sm:$0xff]  ;;  %v183_v50 = vlaneseq  ;;  %s386_s11 = smov [#allocation8]  }
  0x27   :  { %v57_v2 = vld [vmem:[#allocation6] sm:$0xff]  ;;  %v255_v3 = vpack.c.bf16 %v74_v1, %v73_v0  ;;  %v58_v4 = vld [vmem:[#allocation6 + $0x8] sm:$0xff]  ;;  %v75_v5 = vld [vmem:[#allocation6 + $0x90] sm:$0xff]  ;;  %s206_s12 = sshll.u32 %s386_s11, 4  ;;  %s207_s12 = int_to_ptr.vmem [resolvable:$true] %s206_s12 }
  0x28   :  { %v76_v6 = vld [vmem:[#allocation6 + $0x98] sm:$0xff]  ;;  %v257_v7 = vpack.c.bf16 %v58_v4, %v57_v2  ;;  %v59_v9 = vld [vmem:[#allocation6 + $0x10] sm:$0xff]  ;;  %v77_v11 = vld [vmem:[#allocation6 + $0xa0] sm:$0xff]  ;;  %v184_v51 = vshrl.u32 %v183_v50, 7  ;;  %s354_s13 = scalar_lea.vmem %s207_s12, 512  ;;  %p359_p3 = scmp.lt.s32.totalorder %s207_s12, %s207_s12 }
  0x29   :  { %v259_v8 = vpack.c.bf16 %v76_v6, %v75_v5  ;;  %256 = vmatprep.subr.bf16.mxu0 %v255_v3  ;;  %287 = vmatprep.subr.bf16.mxu1 %v255_v3  ;;  %v60_v10 = vld [vmem:[#allocation6 + $0x18] sm:$0xff]  ;;  %v78_v12 = vld [vmem:[#allocation6 + $0xa8] sm:$0xff]  ;;  %v55_v15 = vld [vmem:[#allocation3] sm:$0xff]  ;;  %p355_p2 = scmp.ne.s32.totalorder %s207_s12, %s354_s13  ;;  %p360_p4 = scmp.lt.s32.totalorder %s354_s13, %s354_s13 }
  0x2a   :  { %258 = vmatpush3.bf16.xpose.msra.mxu0 %v257_v7  ;;  %295 = vmatpush3.bf16.xpose.msra.mxu1 %v257_v7  ;;  %v261_v13 = vpack.c.bf16 %v60_v10, %v59_v9  ;;  %v263_v14 = vpack.c.bf16 %v78_v12, %v77_v11  ;;  %v56_v16 = vld [vmem:[#allocation3 + $0x8] sm:$0xff]  ;;  %v61_v17 = vld [vmem:[#allocation6 + $0x20] sm:$0xff]  ;;  %v62_v18 = vld [vmem:[#allocation6 + $0x28] sm:$0xff]  ;;  %v185_v52 = vsub.s32 0, %v184_v51  ;;  %v189_v54 = vsub.s32 1, %v184_v51 }
  0x2b   :  { %260 = vmatprep.subr.bf16.mxu0 %v259_v8  ;;  %288 = vmatprep.subr.bf16.mxu1 %v259_v8  ;;  %v79_v19 = vld [vmem:[#allocation6 + $0xb0] sm:$0xff]  ;;  %v80_v20 = vld [vmem:[#allocation6 + $0xb8] sm:$0xff]  ;;  %v265_v21 = vpack.c.bf16 %v62_v18, %v61_v17  ;;  %v81_v25 = vld [vmem:[#allocation6 + $0xc0] sm:$0xff]  ;;  %p361_p5 = por %p360_p4, %p359_p3 }
  0x2c   :  { %251 = vmatprep.mubr.f32.mxu0 %v55_v15  ;;  %253 = vmatprep.mubr.f32.mxu1 %v56_v16  ;;  %v267_v22 = vpack.c.bf16 %v80_v20, %v79_v19  ;;  %v63_v23 = vld [vmem:[#allocation6 + $0x30] sm:$0xff]  ;;  %v64_v24 = vld [vmem:[#allocation6 + $0x38] sm:$0xff]  ;;  %v82_v26 = vld [vmem:[#allocation6 + $0xc8] sm:$0xff] }
  0x2d   :  { %v269_v27 = vpack.c.bf16 %v64_v24, %v63_v23  ;;  %v271_v28 = vpack.c.bf16 %v82_v26, %v81_v25  ;;  %v65_v29 = vld [vmem:[#allocation6 + $0x40] sm:$0xff]  ;;  %v66_v30 = vld [vmem:[#allocation6 + $0x48] sm:$0xff]  ;;  %v83_v31 = vld [vmem:[#allocation6 + $0xd0] sm:$0xff]  ;;  %p362_p6 = pnand %p361_p5, %p355_p2 }
  0x2e   :  { %v84_v32 = vld [vmem:[#allocation6 + $0xd8] sm:$0xff]  ;;  %v273_v33 = vpack.c.bf16 %v66_v30, %v65_v29  ;;  %v67_v35 = vld [vmem:[#allocation6 + $0x50] sm:$0xff]  ;;  %v85_v37 = vld [vmem:[#allocation6 + $0xe0] sm:$0xff] }
  0x2f   :  { %v275_v34 = vpack.c.bf16 %v84_v32, %v83_v31  ;;  %v68_v36 = vld [vmem:[#allocation6 + $0x58] sm:$0xff]  ;;  %v86_v38 = vld [vmem:[#allocation6 + $0xe8] sm:$0xff]  ;;  %v69_v41 = vld [vmem:[#allocation6 + $0x60] sm:$0xff] }
  0x30   :  { %v277_v39 = vpack.c.bf16 %v68_v36, %v67_v35  ;;  %v279_v40 = vpack.c.bf16 %v86_v38, %v85_v37  ;;  %v70_v42 = vld [vmem:[#allocation6 + $0x68] sm:$0xff]  ;;  %v87_v43 = vld [vmem:[#allocation6 + $0xf0] sm:$0xff]  ;;  %v88_v44 = vld [vmem:[#allocation6 + $0xf8] sm:$0xff] }
  0x31   :  { %v281_v45 = vpack.c.bf16 %v70_v42, %v69_v41  ;;  %v283_v46 = vpack.c.bf16 %v88_v44, %v87_v43  ;;  %v71_v47 = vld [vmem:[#allocation6 + $0x70] sm:$0xff]  ;;  %v72_v48 = vld [vmem:[#allocation6 + $0x78] sm:$0xff] }
  0x32   :  { %262 = vmatpush3.bf16.xpose.msra.mxu0 %v261_v13  ;;  %296 = vmatpush3.bf16.xpose.msra.mxu1 %v261_v13  ;;  %v285_v49 = vpack.c.bf16 %v72_v48, %v71_v47  ;;  %v181_v53 = vld [vmem:[%s450_s2] sm:$0x3] }
  0x33   :  { %264 = vmatprep.subr.bf16.mxu0 %v263_v14  ;;  %289 = vmatprep.subr.bf16.mxu1 %v263_v14  ;;  %v186_v55 = vrot.slane %v181_v53, %v185_v52  ;;  %v190_v56 = vrot.slane %v181_v53, %v189_v54 }
  0x3a   :  { %266 = vmatpush3.bf16.xpose.msra.mxu0 %v265_v21  ;;  %297 = vmatpush3.bf16.xpose.msra.mxu1 %v265_v21 }
  0x3b   :  { %268 = vmatprep.subr.bf16.mxu0 %v267_v22  ;;  %290 = vmatprep.subr.bf16.mxu1 %v267_v22 }
  0x42   :  { %270 = vmatpush3.bf16.xpose.msra.mxu0 %v269_v27  ;;  %298 = vmatpush3.bf16.xpose.msra.mxu1 %v269_v27 }
  0x43   :  { %272 = vmatprep.subr.bf16.mxu0 %v271_v28  ;;  %291 = vmatprep.subr.bf16.mxu1 %v271_v28 }
  0x4a   :  { %274 = vmatpush3.bf16.xpose.msra.mxu0 %v273_v33  ;;  %299 = vmatpush3.bf16.xpose.msra.mxu1 %v273_v33 }
  0x4b   :  { %276 = vmatprep.subr.bf16.mxu0 %v275_v34  ;;  %292 = vmatprep.subr.bf16.mxu1 %v275_v34 }
  0x52   :  { %278 = vmatpush3.bf16.xpose.msra.mxu0 %v277_v39  ;;  %300 = vmatpush3.bf16.xpose.msra.mxu1 %v277_v39 }
  0x53   :  { %280 = vmatprep.subr.bf16.mxu0 %v279_v40  ;;  %293 = vmatprep.subr.bf16.mxu1 %v279_v40 }
  0x5a   :  { %282 = vmatpush3.bf16.xpose.msra.mxu0 %v281_v45  ;;  %301 = vmatpush3.bf16.xpose.msra.mxu1 %v281_v45 }
  0x5b   :  { %284 = vmatprep.subr.bf16.mxu0 %v283_v46  ;;  %294 = vmatprep.subr.bf16.mxu1 %v283_v46 }
  0x62   :  { %286 = vmatpush3.bf16.xpose.msra.mxu0 %v285_v49  ;;  %302 = vmatpush3.bf16.xpose.msra.mxu1 %v285_v49 }
  0x69   :  { %252 = vmatmul.mubr.f32.vlgmr.msra.gmra.mrb[0].mxu0 %v55_v15  ;;  %254 = vmatmul.mubr.f32.vlgmr.msra.gmra.mrb[0].mxu1 %v56_v16 }
 0x13c   :  { %v155_v57 = vpop.f32.mrb[0].mxu0  ;;  %v161_v58 = vpop.f32.mrb[0].mxu1 }
 0x13d   :  { %v193_v59 = vadd.f32 %v186_v55, %v155_v57  ;;  %v195_v60 = vadd.f32 %v186_v55, %v161_v58  ;;  %v157_v61 = vpop.f32.mrb[1].mxu0  ;;  %v163_v62 = vpop.f32.mrb[1].mxu1 }
 0x13e   :  { %v194_v63 = vadd.f32 %v190_v56, %v157_v61  ;;  %v196_v0 = vadd.f32 %v190_v56, %v163_v62 }
 0x13f   :  { %197 = vst [vmem:[#allocation8] sm:$0xff] %v193_v59  ;;  %199 = vst [vmem:[#allocation8 + $0x10] sm:$0xff] %v195_v60 }
 0x140   :  { %198 = vst [vmem:[#allocation8 + $0x8] sm:$0xff] %v194_v63  ;;  %200 = vst [vmem:[#allocation8 + $0x18] sm:$0xff] %v196_v0 }
 0x141   :  { %365 = shalt.err (!%p362_p6)
}
 0x142   :  { %s366_s15 = scalar_lea.hbm %s451_s3, 512 }
 0x143   :  { %p367_p7 = scmp.ne.s32.totalorder %s451_s3, %s366_s15  ;;  %p370_p8 = scmp.lt.u32.totalorder %s366_s15, %s451_s3 }
 0x145   :  { %p372_p9 = pnand %p370_p8, %p367_p7 }
 0x147   :  { %375 = shalt.err (!%p372_p9)
}
 0x148   :  { %s387_s20 = smov 256   ;;  %s388_s21 = smov 16  }
 0x149   :  { %212 = dma.vmem_to_hbm [thread:$0]  %s207_s12, 512, %s451_s3, [#allocation5], %s387_s20, %s387_s20, %s388_s21  }
 0x14a   :  { %380 = dma.done.wait [#allocation5], 512  }
 0x14b   :  { %381 = vsyncadd [#allocation5], 4294966784 }
 0x14c   :  { %216 = vsyncpa [#allocation4], 1 }
 0x14d   :  { %217 = vsyncpa [#allocation7], 1 }
 0x14e   :  { %218 = vsyncpa [#allocation5], 1 }

</bundles_post_ra>
